<compile_context>
chip_gen: v5e
topology: v5e:2x2
jax: 0.10.0
libtpu: 0.0.40
codegen_flags: <defaults>
</compile_context>

<pallas_src>
from functools import partial

import jax
import jax.numpy as jnp
from jax.experimental import pallas as pl
from jax.experimental.pallas import tpu as pltpu

VOCAB = 64          # stand-in for len(libs.model_loader)
HIDDEN = 200        # embedding dim, as in the module
NUM_CLASSES = 2
VOCAB_PAD = VOCAB   # table block == full array dims -> no 128-lane padding needed
TILE_N = 2048       # tokens per grid step (multiple of 128)


def _lookup_kernel(ids_ref, tbl_ref, out_ref):
    """Per-token lookup of the fused (classes, vocab) log-prob table.

    ids_ref: (1, TN) int32    tbl_ref: (C, VOCAB_PAD) f32    out_ref: (C, TN) f32
    """
    ids = ids_ref[...]                                           # (1, TN)
    vpad = tbl_ref.shape[1]

    # One-hot with vocab on the sublane axis and tokens on the lane axis.
    # The iota is only (vpad, 1); the compare broadcasts against (1, TN),
    # avoiding a full (vpad, TN) iota materialization every grid step.
    col = jax.lax.broadcasted_iota(jnp.int32, (vpad, 1), 0)      # (VPAD, 1)
    onehot = (col == ids).astype(jnp.float32)                    # (VPAD, TN)

    # (C, VPAD) @ (VPAD, TN) -> (C, TN): lane-dense output (tokens on the
    # 128-lane axis), one MXU pass, exact (0/1 weights).
    out_ref[...] = jnp.dot(tbl_ref[...], onehot,
                           preferred_element_type=jnp.float32)


def precompute_logprob_table(emb_table, weight_t, bias):
    """Weight-only fusion, done once at load time (NOT per forward call):
       log_softmax(emb[id] @ W + b) == log_softmax(emb @ W + b)[id]
    Returns the fused table transposed to (C, VOCAB_PAD) for lane-dense output.
    """
    logits_tbl = emb_table @ weight_t + bias                     # (VOCAB, C)
    log_tbl = jax.nn.log_softmax(logits_tbl, axis=-1)            # (VOCAB, C)
    tbl_t = log_tbl.T.astype(jnp.float32)                        # (C, VOCAB)
    if VOCAB_PAD > VOCAB:
        tbl_t = jnp.pad(tbl_t, ((0, 0), (0, VOCAB_PAD - VOCAB)))
    return tbl_t                                                 # (C, VOCAB_PAD)


@partial(jax.jit, static_argnames=("tile_n",))
def my_model_forward(token_ids, log_tbl_t, *, tile_n=TILE_N):
    """token_ids: (B, L) int, log_tbl_t: (C, VOCAB_PAD) f32
       -> (B, L, NUM_CLASSES) f32 log-probs (matches the PyTorch module)."""
    B, L = token_ids.shape
    N = B * L

    # Tile the token axis; shrink the tile for tiny inputs, pad N up to it.
    tn = max(128, min(tile_n, pl.cdiv(N, 128) * 128))
    n_pad = pl.cdiv(N, tn) * tn
    ids_flat = token_ids.reshape(-1).astype(jnp.int32)
    ids_flat = jnp.pad(ids_flat, (0, n_pad - N)).reshape(1, n_pad)

    out_t = pl.pallas_call(
        _lookup_kernel,
        out_shape=jax.ShapeDtypeStruct((NUM_CLASSES, n_pad), jnp.float32),
        grid=(n_pad // tn,),
        in_specs=[
            pl.BlockSpec((1, tn), lambda i: (0, i)),                    # ids tile
            pl.BlockSpec((NUM_CLASSES, VOCAB_PAD), lambda i: (0, 0)),   # fused table
        ],
        out_specs=pl.BlockSpec((NUM_CLASSES, tn), lambda i: (0, i)),
        compiler_params=pltpu.CompilerParams(
            dimension_semantics=("parallel",)),                  # megacore-shardable
    )(ids_flat, log_tbl_t)

    # (C, N_pad) -> (B, L, C); padded token columns sliced off.  Consumers that
    # accept a (C, N) layout can use out_t directly and skip this transpose.
    return out_t[:, :N].T.reshape(B, L, NUM_CLASSES)


if __name__ == "__main__":
    key = jax.random.PRNGKey(0)
    k_emb, k_w, k_b, k_ids = jax.random.split(key, 4)

    # Deterministic synthetic parameters (no checkpoint loading).
    emb_table = jax.random.normal(k_emb, (VOCAB, HIDDEN), jnp.float32) * 0.02
    weight_t = jax.random.normal(k_w, (HIDDEN, NUM_CLASSES), jnp.float32) * 0.05
    bias = jax.random.normal(k_b, (NUM_CLASSES,), jnp.float32) * 0.01

    # Weight-only precompute: done once, reused by every forward call.
    log_tbl_t = jax.block_until_ready(
        precompute_logprob_table(emb_table, weight_t, bias))

    # Example inputs: batch=2, max_len=8 of token ids.
    token_ids = jax.random.randint(k_ids, (2, 8), 0, VOCAB, dtype=jnp.int32)

    out = my_model_forward(token_ids, log_tbl_t)
    out = jax.block_until_ready(out)

    # Sanity check against a pure-JAX reference of the original module.
    x_ref = emb_table[token_ids]                       # (B, L, D)
    logits_ref = x_ref @ weight_t + bias               # (B, L, C)
    ref = jax.nn.log_softmax(logits_ref, axis=-1)
    assert out.shape == (2, 8, NUM_CLASSES)
    assert jnp.allclose(out, ref, atol=1e-5), "mismatch vs reference"

    print("KERNEL_OK")
</pallas_src>

<mosaic_0001>
module attributes {stable_mosaic.version = 11 : i64} {
  func.func @_lookup_kernel(%arg0: i32, %arg1: memref<1x128xi32, #tpu.memory_space<vmem>>, %arg2: memref<2x64xf32, #tpu.memory_space<vmem>>, %arg3: memref<2x128xf32, #tpu.memory_space<vmem>>) attributes {dimension_semantics = [#tpu.dimension_semantics<parallel>], iteration_bounds = array<i64: 1>, scalar_prefetch = 0 : i64, scratch_operands = 0 : i64, tpu.core_type = #tpu.core_type<tc>, window_params = [{transform_indices = @transform_0, window_bounds = array<i64: 1, 128>}, {pipeline_mode = #tpu.pipeline_mode<synchronous>, transform_indices = @transform_1, window_bounds = array<i64: 2, 64>}, {transform_indices = @transform_2, window_bounds = array<i64: 2, 128>}]} {
    %c0 = arith.constant 0 : index
    %c0_0 = arith.constant 0 : index
    %0 = vector.load %arg1[%c0, %c0_0] : memref<1x128xi32, #tpu.memory_space<vmem>>, vector<1x128xi32>
    %1 = tpu.iota {dimensions = array<i32: 0>} : vector<64x1xi32>
    %2 = vector.broadcast %1 : vector<64x1xi32> to vector<64x128xi32>
    %3 = vector.broadcast %0 : vector<1x128xi32> to vector<64x128xi32>
    %4 = arith.cmpi eq, %2, %3 : vector<64x128xi32>
    %5 = arith.extui %4 : vector<64x128xi1> to vector<64x128xi32>
    %6 = arith.sitofp %5 : vector<64x128xi32> to vector<64x128xf32>
    %c0_1 = arith.constant 0 : index
    %c0_2 = arith.constant 0 : index
    %7 = vector.load %arg2[%c0_1, %c0_2] : memref<2x64xf32, #tpu.memory_space<vmem>>, vector<2x64xf32>
    %cst = arith.constant dense<0.000000e+00> : vector<2x128xf32>
    %8 = tpu.matmul %7, %6, %cst {dimension_numbers = #tpu.dot_dimension_numbers<[1], [0], [0], [1], [0, 0, 1, 1], [], []>} : vector<2x64xf32>, vector<64x128xf32>, vector<2x128xf32> -> vector<2x128xf32>
    %c0_3 = arith.constant 0 : index
    %c0_4 = arith.constant 0 : index
    %9 = vector.load %arg3[%c0_3, %c0_4] : memref<2x128xf32, #tpu.memory_space<vmem>>, vector<2x128xf32>
    tpu.vector_store %arg3[%c0_3, %c0_4], %8 {strides = array<i32>} : memref<2x128xf32, #tpu.memory_space<vmem>>, vector<2x128xf32>,
    return
  }
  func.func @transform_0(%arg0: i32) -> (i32, i32) {
    %c0_i32 = arith.constant 0 : i32
    %c0_i32_0 = arith.constant 0 : i32
    return %c0_i32, %arg0 : i32, i32
  }
  func.func @transform_1(%arg0: i32) -> (i32, i32) {
    %c0_i32 = arith.constant 0 : i32
    %c0_i32_0 = arith.constant 0 : i32
    %c0_i32_1 = arith.constant 0 : i32
    return %c0_i32, %c0_i32_0 : i32, i32
  }
  func.func @transform_2(%arg0: i32) -> (i32, i32) {
    %c0_i32 = arith.constant 0 : i32
    %c0_i32_0 = arith.constant 0 : i32
    return %c0_i32, %arg0 : i32, i32
  }
}

</mosaic_0001>

<bundles_post_ra>
// kernel: my_model_forward.1
= control target key start
LH: loop header
LB: loop body
LE: loop exit
PB: predicated region body
PF: predicated region fallthrough
CT: control target
= control target key end

     0   :  { %v12_v0 = vlaneseq  ;;  %v95_v7 = vmov 1.0   ;;  %vm47_vm8 = vcmask 523264   ;;  %s120_s0 = inlined_call_operand.vmem [shape: s32[1,128], index: 0, kind: input, shape index: {}]   ;;  %s121_s1 = inlined_call_operand.vmem [shape: f32[2,64], index: 1, kind: input, shape index: {}]   ;;  %s122_s2 = inlined_call_operand.vmem [shape: f32[2,128], index: 2, kind: output, shape index: {}]  }
   0x1   :  { %v94_v2 = vld [vmem:[%s120_s0] ss:$0 sm:$0xff] }
   0x2   :  { %v13_v1 = vshrl.u32 %v12_v0, 7  ;;  %v46_v11 = vld [vmem:[%s121_s1] sm:$0x3] }
   0x4   :  { %v20_v3 = vadd.s32 56, %v13_v1  ;;  %v19_v4 = vadd.s32 48, %v13_v1  ;;  %v18_v5 = vadd.s32 40, %v13_v1  ;;  %v17_v6 = vadd.s32 32, %v13_v1 }
   0x5   :  { %v16_v8 = vadd.s32 24, %v13_v1  ;;  %v15_v9 = vadd.s32 16, %v13_v1  ;;  %v14_v10 = vadd.s32 8, %v13_v1  ;;  %vm22_vm7 = vcmp.eq.s32.totalorder %v13_v1, %v94_v2 }
   0x6   :  { %vm29_vm0 = vcmp.eq.s32.totalorder %v20_v3, %v94_v2  ;;  %vm28_vm1 = vcmp.eq.s32.totalorder %v19_v4, %v94_v2  ;;  %vm27_vm2 = vcmp.eq.s32.totalorder %v18_v5, %v94_v2  ;;  %vm26_vm3 = vcmp.eq.s32.totalorder %v17_v6, %v94_v2 }
   0x7   :  { %84 = vmatpush.msk.msra.mxu0 %vm29_vm0, %v95_v7  ;;  %vm25_vm4 = vcmp.eq.s32.totalorder %v16_v8, %v94_v2  ;;  %vm24_vm5 = vcmp.eq.s32.totalorder %v15_v9, %v94_v2  ;;  %vm23_vm6 = vcmp.eq.s32.totalorder %v14_v10, %v94_v2 }
   0x9   :  { %85 = vmatpush.msk.msra.mxu0 %vm28_vm1, %v95_v7 }
   0xb   :  { %86 = vmatpush.msk.msra.mxu0 %vm27_vm2, %v95_v7 }
   0xd   :  { %87 = vmatpush.msk.msra.mxu0 %vm26_vm3, %v95_v7 }
   0xf   :  { %88 = vmatpush.msk.msra.mxu0 %vm25_vm4, %v95_v7 }
  0x11   :  { %89 = vmatpush.msk.msra.mxu0 %vm24_vm5, %v95_v7 }
  0x13   :  { %90 = vmatpush.msk.msra.mxu0 %vm23_vm6, %v95_v7 }
  0x15   :  { %91 = vmatpush.msk.msra.mxu0 %vm22_vm7, %v95_v7 }
  0x16   :  { %92 = vmatmul.msk.f32.vlgmr.msra.gmra.mxu0 %vm47_vm8, %v46_v11 }
  0x93   :  { %v68_v12 = vpop.f32.mrf.mxu0 }
  0x94   :  { %71 = vst [vmem:[%s122_s2] sm:$0x3] %v68_v12 }

</bundles_post_ra>
